<compile_context>
chip_gen: v5e
topology: v5e:2x2
jax: 0.10.0
libtpu: 0.0.40
codegen_flags: <defaults>
</compile_context>

<pallas_src>
import jax
import jax.numpy as jnp
from jax.experimental import pallas as pl
from jax.experimental.pallas import tpu as pltpu


# ----------------------------- Pallas kernel ------------------------------

def _make_temporal_block_kernel(*, cout, K, dilation, L):
    """Builds the kernel body for static (cout, K, dilation, L)."""
    shifts = tuple(dilation * (K - 1 - k) for k in range(K))

    def kernel(x_ref, wcat1_ref, w2_ref, b1_ref, b2_ref, bd_ref, o_ref):
        # x_ref    : (Cin, bt*L)        input slab in compute dtype (time on lanes)
        # wcat1_ref: ((K+1)*Cout, Cin)  conv1 taps stacked + 1x1 downsample weight
        # w2_ref   : (K*Cout, Cout)     conv2 taps stacked
        # b1/b2/bd : (Cout, 1) f32      biases (broadcast along lanes)
        # o_ref    : (Cout, bt*L) f32   output slab (lane-dense stores)
        btL = o_ref.shape[-1]
        x = x_ref[...]
        w1 = wcat1_ref[...]
        w2 = w2_ref[...]

        # Local time index within each length-L batch segment (hoisted once;
        # shared by both convs).  Zeroing lanes with t_local < shift is both the
        # causal left-pad of the conv AND the guard that stops the roll from
        # bleeding data across fused batch segments / the wrap-around.
        t_local = jax.lax.broadcasted_iota(jnp.int32, (cout, btL), 1) % L

        def causal_sum(p):
            # p: (K*Cout [+...], btL) f32 stacked per-tap contributions.
            acc = jnp.zeros((cout, btL), jnp.float32)
            for k, s in enumerate(shifts):
                pk = p[k * cout:(k + 1) * cout, :]
                if s == 0:
                    acc = acc + pk
                else:
                    rolled = pltpu.roll(pk, shift=s, axis=1)   # XLU lane shift
                    acc = acc + jnp.where(t_local < s, 0.0, rolled)
            return acc

        # conv1 taps + residual 1x1 downsample fused into ONE MXU push.
        p = jnp.dot(w1, x, preferred_element_type=jnp.float32)      # ((K+1)Cout, btL)
        h = jnp.maximum(causal_sum(p) + b1_ref[...], 0.0)           # relu1; dropout1=id (eval)
        res = p[K * cout:, :] + bd_ref[...]                         # 1x1 downsample residual

        # conv2: ONE stacked matmul.  Deliberate choice: h is re-quantized to the
        # compute dtype for the MXU operand (bf16 path); accumulation stays f32.
        q = jnp.dot(w2, h.astype(w2.dtype), preferred_element_type=jnp.float32)
        out = jnp.maximum(causal_sum(q) + b2_ref[...], 0.0)         # relu2; dropout2=id (eval)

        o_ref[...] = jnp.maximum(out + res, 0.0).astype(o_ref.dtype)

    return kernel


# ---------------------- one-time parameter preparation --------------------

def weight_norm_effective(v, g):
    """PyTorch weight_norm(dim=0): W[o] = g[o] * v[o] / ||v[o]||."""
    norm = jnp.sqrt(jnp.sum(v * v, axis=(1, 2), keepdims=True))
    return g.reshape(-1, 1, 1) * v / norm


def prepare_temporal_block_params(w1, b1, w2, b2, wd, bd, *, dilation,
                                  compute_dtype=jnp.bfloat16):
    """One-time re-layout of parameters into kernel form (hoisted off hot path).

    w1: (Cout, Cin, K)  w2: (Cout, Cout, K)  wd: (Cout, Cin, 1)  b*: (Cout,)
    """
    cout, cin, K = w1.shape

    # Stack conv1 taps along the output-channel dim and append the 1x1
    # downsample weight -> one fused matmul operand ((K+1)*Cout, Cin).
    w1_taps = jnp.transpose(w1, (2, 0, 1)).reshape(K * cout, cin)
    wcat1 = jnp.concatenate([w1_taps, wd[:, :, 0]], axis=0).astype(compute_dtype)
    w2_taps = jnp.transpose(w2, (2, 0, 1)).reshape(K * cout, cout).astype(compute_dtype)

    # Biases oriented (Cout, 1) so they broadcast along the time/lane axis; f32.
    b1c = b1.reshape(cout, 1).astype(jnp.float32)
    b2c = b2.reshape(cout, 1).astype(jnp.float32)
    bdc = bd.reshape(cout, 1).astype(jnp.float32)

    return dict(wcat1=wcat1, w2=w2_taps, b1=b1c, b2=b2c, bd=bdc,
                dilation=int(dilation), kernel_size=int(K),
                n_inputs=int(cin), n_outputs=int(cout))


# ------------------------------- wrapper ----------------------------------

def _pick_batch_tile(B, L, requested):
    """Largest batch_tile that keeps vreg/VMEM pressure modest and, when
    possible, >= 2 grid steps so "parallel" feeds both v7x TensorCores."""
    if requested is not None:
        assert B % requested == 0, "batch must be divisible by batch_tile"
        assert requested == B or (requested * L) % 128 == 0, \
            "batch_tile*L must be a multiple of 128 (or batch_tile == B)"
        return requested
    # Cap bt*L: the (K+1)*Cout x bt*L f32 intermediates live in vregs/VMEM.
    max_cols = 2048
    cands = [bt for bt in range(1, B + 1)
             if B % bt == 0 and (bt == B or (bt * L) % 128 == 0)
             and bt * L <= max_cols]
    if not cands:
        return B                       # grid of 1, full-extent block (always legal)
    multi = [bt for bt in cands if B // bt >= 2]
    return max(multi) if multi else max(cands)


def temporal_block_forward(x_ncl, params, *, batch_tile=None):
    """x_ncl: (B, Cin, L) f32 in PyTorch NCL layout. Returns (B, Cout, L) f32."""
    B, cin, L = x_ncl.shape
    cout = params["n_outputs"]
    K = params["kernel_size"]
    dilation = params["dilation"]
    compute_dtype = params["wcat1"].dtype
    assert cin == params["n_inputs"]

    bt = _pick_batch_tile(B, L, batch_tile)
    grid = B // bt
    btL = bt * L

    # Layout plumbing only (not compute hoisting): present time-on-lanes slabs
    # (Cin, B*L) so each grid step is one wide matmul with lane-dense stores.
    x_cbl = jnp.transpose(x_ncl, (1, 0, 2)).reshape(cin, B * L).astype(compute_dtype)

    kernel = _make_temporal_block_kernel(cout=cout, K=K, dilation=dilation, L=L)

    y = pl.pallas_call(
        kernel,
        out_shape=jax.ShapeDtypeStruct((cout, B * L), jnp.float32),
        grid_spec=pltpu.PrefetchScalarGridSpec(
            num_scalar_prefetch=0,
            grid=(grid,),
            in_specs=[
                pl.BlockSpec((cin, btL), lambda i: (0, i)),        # x slab
                pl.BlockSpec(params["wcat1"].shape, lambda i: (0, 0)),
                pl.BlockSpec(params["w2"].shape, lambda i: (0, 0)),
                pl.BlockSpec((cout, 1), lambda i: (0, 0)),
                pl.BlockSpec((cout, 1), lambda i: (0, 0)),
                pl.BlockSpec((cout, 1), lambda i: (0, 0)),
            ],
            out_specs=pl.BlockSpec((cout, btL), lambda i: (0, i)),
        ),
        compiler_params=pltpu.CompilerParams(
            dimension_semantics=("parallel",)),   # >= 2 steps -> both v7x cores busy
    )(x_cbl, params["wcat1"], params["w2"], params["b1"], params["b2"],
      params["bd"])

    # Back to PyTorch NCL layout.
    return jnp.transpose(y.reshape(cout, B, L), (1, 0, 2))


# ---------------- deterministic parameter construction --------------------

def make_params(key, n_inputs, n_outputs, kernel_size):
    ks = jax.random.split(key, 8)
    v1 = 0.01 * jax.random.normal(ks[0], (n_outputs, n_inputs, kernel_size), jnp.float32)
    g1 = 1.0 + 0.1 * jax.random.normal(ks[1], (n_outputs,), jnp.float32)
    b1 = 0.1 * jax.random.normal(ks[2], (n_outputs,), jnp.float32)
    v2 = 0.01 * jax.random.normal(ks[3], (n_outputs, n_outputs, kernel_size), jnp.float32)
    g2 = 1.0 + 0.1 * jax.random.normal(ks[4], (n_outputs,), jnp.float32)
    b2 = 0.1 * jax.random.normal(ks[5], (n_outputs,), jnp.float32)
    wd = 0.01 * jax.random.normal(ks[6], (n_outputs, n_inputs, 1), jnp.float32)
    bd = 0.1 * jax.random.normal(ks[7], (n_outputs,), jnp.float32)
    w1 = weight_norm_effective(v1, g1)
    w2 = weight_norm_effective(v2, g2)
    return w1, b1, w2, b2, wd, bd


# ---------------- pure-JAX reference for verification ---------------------

def ref_forward(x, w1, b1, w2, b2, wd, bd, *, dilation, padding):
    def causal_conv(inp, w, b):
        B, _, L = inp.shape
        cout, _, K = w.shape
        xp = jnp.pad(inp, ((0, 0), (0, 0), (padding, 0)))
        out = jnp.zeros((B, cout, L), jnp.float32)
        for k in range(K):
            out = out + jnp.einsum('bcl,oc->bol',
                                   xp[:, :, k * dilation:k * dilation + L],
                                   w[:, :, k])
        return out + b[None, :, None]

    h = jax.nn.relu(causal_conv(x, w1, b1))
    o = jax.nn.relu(causal_conv(h, w2, b2))
    res = jnp.einsum('bcl,oc->bol', x, wd[:, :, 0]) + bd[None, :, None]
    return jax.nn.relu(o + res)


if __name__ == "__main__":
    # TemporalBlock(n_inputs=4, n_outputs=8, kernel_size=3, stride=1,
    #               dilation=2, padding=(3-1)*2=4, dropout=0.2) in eval mode.
    B, Cin, Cout, L, K, dilation = 2, 4, 8, 128, 3, 2
    padding = (K - 1) * dilation

    key = jax.random.PRNGKey(0)
    kx, kp = jax.random.split(key)
    x = jax.random.normal(kx, (B, Cin, L), jnp.float32)
    w1, b1, w2, b2, wd, bd = make_params(kp, Cin, Cout, K)

    y_ref = ref_forward(x, w1, b1, w2, b2, wd, bd,
                        dilation=dilation, padding=padding)

    # ---- f32 compute path (exact check against the pure-JAX reference) ----
    params_f32 = prepare_temporal_block_params(
        w1, b1, w2, b2, wd, bd, dilation=dilation, compute_dtype=jnp.float32)
    y32 = temporal_block_forward(x, params_f32)
    y32 = jax.block_until_ready(y32)
    assert y32.shape == (B, Cout, L)
    assert jnp.allclose(y32, y_ref, atol=1e-5, rtol=1e-5), "f32 mismatch vs reference"

    # ---- bf16 compute path (default: bf16 MXU operands, f32 accumulation) ----
    params_bf16 = prepare_temporal_block_params(
        w1, b1, w2, b2, wd, bd, dilation=dilation)   # compute_dtype=bf16 default
    y16 = temporal_block_forward(x, params_bf16)
    y16 = jax.block_until_ready(y16)
    cast = lambda a: a.astype(jnp.bfloat16).astype(jnp.float32)
    y_ref16 = ref_forward(cast(x), cast(w1), b1, cast(w2), b2, cast(wd), bd,
                          dilation=dilation, padding=padding)
    assert jnp.allclose(y16, y_ref16, atol=5e-2, rtol=5e-2), "bf16 mismatch vs reference"

    print("KERNEL_OK")
</pallas_src>

<mosaic_0001>
module attributes {stable_mosaic.version = 11 : i64} {
  func.func @kernel(%arg0: i32, %arg1: memref<4x128xf32, #tpu.memory_space<vmem>>, %arg2: memref<32x4xf32, #tpu.memory_space<vmem>>, %arg3: memref<24x8xf32, #tpu.memory_space<vmem>>, %arg4: memref<8x1xf32, #tpu.memory_space<vmem>>, %arg5: memref<8x1xf32, #tpu.memory_space<vmem>>, %arg6: memref<8x1xf32, #tpu.memory_space<vmem>>, %arg7: memref<8x128xf32, #tpu.memory_space<vmem>>) attributes {dimension_semantics = [#tpu.dimension_semantics<parallel>], iteration_bounds = array<i64: 2>, scalar_prefetch = 0 : i64, scratch_operands = 0 : i64, tpu.core_type = #tpu.core_type<tc>, window_params = [{transform_indices = @transform_0, window_bounds = array<i64: 4, 128>}, {pipeline_mode = #tpu.pipeline_mode<synchronous>, transform_indices = @transform_1, window_bounds = array<i64: 32, 4>}, {pipeline_mode = #tpu.pipeline_mode<synchronous>, transform_indices = @transform_2, window_bounds = array<i64: 24, 8>}, {pipeline_mode = #tpu.pipeline_mode<synchronous>, transform_indices = @transform_3, window_bounds = array<i64: 8, 1>}, {pipeline_mode = #tpu.pipeline_mode<synchronous>, transform_indices = @transform_4, window_bounds = array<i64: 8, 1>}, {pipeline_mode = #tpu.pipeline_mode<synchronous>, transform_indices = @transform_5, window_bounds = array<i64: 8, 1>}, {transform_indices = @transform_6, window_bounds = array<i64: 8, 128>}]} {
    %c0 = arith.constant 0 : index
    %c0_0 = arith.constant 0 : index
    %0 = vector.load %arg1[%c0, %c0_0] : memref<4x128xf32, #tpu.memory_space<vmem>>, vector<4x128xf32>
    %c0_1 = arith.constant 0 : index
    %c0_2 = arith.constant 0 : index
    %1 = vector.load %arg2[%c0_1, %c0_2] : memref<32x4xf32, #tpu.memory_space<vmem>>, vector<32x4xf32>
    %c0_3 = arith.constant 0 : index
    %c0_4 = arith.constant 0 : index
    %2 = vector.load %arg3[%c0_3, %c0_4] : memref<24x8xf32, #tpu.memory_space<vmem>>, vector<24x8xf32>
    %3 = tpu.iota {dimensions = array<i32: 1>} : vector<8x128xi32>
    %c128_i32 = arith.constant 128 : i32
    %c0_i32 = arith.constant 0 : i32
    %4 = arith.cmpi eq, %c128_i32, %c0_i32 : i32
    %c1_i32 = arith.constant 1 : i32
    %5 = arith.select %4, %c1_i32, %c128_i32 : i32
    %6 = vector.broadcast %5 : i32 to vector<8x128xi32>
    %7 = arith.remsi %3, %6 : vector<8x128xi32>
    %c0_i32_5 = arith.constant 0 : i32
    %8 = vector.broadcast %c0_i32_5 : i32 to vector<8x128xi32>
    %9 = arith.cmpi ne, %7, %8 : vector<8x128xi32>
    %c0_i32_6 = arith.constant 0 : i32
    %10 = vector.broadcast %c0_i32_6 : i32 to vector<8x128xi32>
    %11 = arith.cmpi slt, %7, %10 : vector<8x128xi32>
    %c0_i32_7 = arith.constant 0 : i32
    %12 = arith.cmpi slt, %5, %c0_i32_7 : i32
    %13 = vector.broadcast %12 : i1 to vector<8x128xi1>
    %14 = vector.broadcast %13 : vector<8x128xi1> to vector<8x128xi1>
    %15 = arith.xori %11, %14 : vector<8x128xi1>
    %16 = arith.andi %15, %9 : vector<8x128xi1>
    %17 = vector.broadcast %5 : i32 to vector<8x128xi32>
    %18 = arith.addi %7, %17 : vector<8x128xi32>
    %19 = arith.select %16, %18, %7 : vector<8x128xi1>, vector<8x128xi32>
    %cst = arith.constant dense<0.000000e+00> : vector<32x128xf32>
    %20 = tpu.matmul %1, %0, %cst {dimension_numbers = #tpu.dot_dimension_numbers<[1], [0], [0], [1], [0, 0, 1, 1], [], []>} : vector<32x4xf32>, vector<4x128xf32>, vector<32x128xf32> -> vector<32x128xf32>
    %cst_8 = arith.constant 0.000000e+00 : f32
    %21 = vector.broadcast %cst_8 : f32 to vector<8x128xf32>
    %22 = vector.extract_strided_slice %20 {offsets = [0, 0], sizes = [8, 128], strides = [1, 1]} : vector<32x128xf32> to vector<8x128xf32>
    %c4_i32 = arith.constant 4 : i32
    %23 = tpu.dynamic_rotate %22 by %c4_i32 dim 1 : vector<8x128xf32>, i32 -> vector<8x128xf32>
    %c4_i32_9 = arith.constant 4 : i32
    %24 = vector.broadcast %c4_i32_9 : i32 to vector<8x128xi32>
    %25 = arith.cmpi slt, %19, %24 : vector<8x128xi32>
    %cst_10 = arith.constant 0.000000e+00 : f32
    %26 = vector.broadcast %cst_10 : f32 to vector<8x128xf32>
    %27 = arith.select %25, %26, %23 : vector<8x128xi1>, vector<8x128xf32>
    %28 = arith.addf %21, %27 : vector<8x128xf32>
    %29 = vector.extract_strided_slice %20 {offsets = [8, 0], sizes = [8, 128], strides = [1, 1]} : vector<32x128xf32> to vector<8x128xf32>
    %c2_i32 = arith.constant 2 : i32
    %30 = tpu.dynamic_rotate %29 by %c2_i32 dim 1 : vector<8x128xf32>, i32 -> vector<8x128xf32>
    %c2_i32_11 = arith.constant 2 : i32
    %31 = vector.broadcast %c2_i32_11 : i32 to vector<8x128xi32>
    %32 = arith.cmpi slt, %19, %31 : vector<8x128xi32>
    %cst_12 = arith.constant 0.000000e+00 : f32
    %33 = vector.broadcast %cst_12 : f32 to vector<8x128xf32>
    %34 = arith.select %32, %33, %30 : vector<8x128xi1>, vector<8x128xf32>
    %35 = arith.addf %28, %34 : vector<8x128xf32>
    %36 = vector.extract_strided_slice %20 {offsets = [16, 0], sizes = [8, 128], strides = [1, 1]} : vector<32x128xf32> to vector<8x128xf32>
    %37 = arith.addf %35, %36 : vector<8x128xf32>
    %c0_13 = arith.constant 0 : index
    %c0_14 = arith.constant 0 : index
    %38 = vector.load %arg4[%c0_13, %c0_14] : memref<8x1xf32, #tpu.memory_space<vmem>>, vector<8x1xf32>
    %39 = vector.broadcast %38 : vector<8x1xf32> to vector<8x128xf32>
    %40 = arith.addf %37, %39 : vector<8x128xf32>
    %cst_15 = arith.constant 0.000000e+00 : f32
    %41 = vector.broadcast %cst_15 : f32 to vector<8x128xf32>
    %42 = arith.maximumf %40, %41 : vector<8x128xf32>
    %43 = vector.extract_strided_slice %20 {offsets = [24, 0], sizes = [8, 128], strides = [1, 1]} : vector<32x128xf32> to vector<8x128xf32>
    %c0_16 = arith.constant 0 : index
    %c0_17 = arith.constant 0 : index
    %44 = vector.load %arg6[%c0_16, %c0_17] : memref<8x1xf32, #tpu.memory_space<vmem>>, vector<8x1xf32>
    %45 = vector.broadcast %44 : vector<8x1xf32> to vector<8x128xf32>
    %46 = arith.addf %43, %45 : vector<8x128xf32>
    %cst_18 = arith.constant dense<0.000000e+00> : vector<24x128xf32>
    %47 = tpu.matmul %2, %42, %cst_18 {dimension_numbers = #tpu.dot_dimension_numbers<[1], [0], [0], [1], [0, 0, 1, 1], [], []>} : vector<24x8xf32>, vector<8x128xf32>, vector<24x128xf32> -> vector<24x128xf32>
    %cst_19 = arith.constant 0.000000e+00 : f32
    %48 = vector.broadcast %cst_19 : f32 to vector<8x128xf32>
    %49 = vector.extract_strided_slice %47 {offsets = [0, 0], sizes = [8, 128], strides = [1, 1]} : vector<24x128xf32> to vector<8x128xf32>
    %c4_i32_20 = arith.constant 4 : i32
    %50 = tpu.dynamic_rotate %49 by %c4_i32_20 dim 1 : vector<8x128xf32>, i32 -> vector<8x128xf32>
    %c4_i32_21 = arith.constant 4 : i32
    %51 = vector.broadcast %c4_i32_21 : i32 to vector<8x128xi32>
    %52 = arith.cmpi slt, %19, %51 : vector<8x128xi32>
    %cst_22 = arith.constant 0.000000e+00 : f32
    %53 = vector.broadcast %cst_22 : f32 to vector<8x128xf32>
    %54 = arith.select %52, %53, %50 : vector<8x128xi1>, vector<8x128xf32>
    %55 = arith.addf %48, %54 : vector<8x128xf32>
    %56 = vector.extract_strided_slice %47 {offsets = [8, 0], sizes = [8, 128], strides = [1, 1]} : vector<24x128xf32> to vector<8x128xf32>
    %c2_i32_23 = arith.constant 2 : i32
    %57 = tpu.dynamic_rotate %56 by %c2_i32_23 dim 1 : vector<8x128xf32>, i32 -> vector<8x128xf32>
    %c2_i32_24 = arith.constant 2 : i32
    %58 = vector.broadcast %c2_i32_24 : i32 to vector<8x128xi32>
    %59 = arith.cmpi slt, %19, %58 : vector<8x128xi32>
    %cst_25 = arith.constant 0.000000e+00 : f32
    %60 = vector.broadcast %cst_25 : f32 to vector<8x128xf32>
    %61 = arith.select %59, %60, %57 : vector<8x128xi1>, vector<8x128xf32>
    %62 = arith.addf %55, %61 : vector<8x128xf32>
    %63 = vector.extract_strided_slice %47 {offsets = [16, 0], sizes = [8, 128], strides = [1, 1]} : vector<24x128xf32> to vector<8x128xf32>
    %64 = arith.addf %62, %63 : vector<8x128xf32>
    %c0_26 = arith.constant 0 : index
    %c0_27 = arith.constant 0 : index
    %65 = vector.load %arg5[%c0_26, %c0_27] : memref<8x1xf32, #tpu.memory_space<vmem>>, vector<8x1xf32>
    %66 = vector.broadcast %65 : vector<8x1xf32> to vector<8x128xf32>
    %67 = arith.addf %64, %66 : vector<8x128xf32>
    %cst_28 = arith.constant 0.000000e+00 : f32
    %68 = vector.broadcast %cst_28 : f32 to vector<8x128xf32>
    %69 = arith.maximumf %67, %68 : vector<8x128xf32>
    %70 = arith.addf %69, %46 : vector<8x128xf32>
    %cst_29 = arith.constant 0.000000e+00 : f32
    %71 = vector.broadcast %cst_29 : f32 to vector<8x128xf32>
    %72 = arith.maximumf %70, %71 : vector<8x128xf32>
    %c0_30 = arith.constant 0 : index
    %c0_31 = arith.constant 0 : index
    %73 = vector.load %arg7[%c0_30, %c0_31] : memref<8x128xf32, #tpu.memory_space<vmem>>, vector<8x128xf32>
    tpu.vector_store %arg7[%c0_30, %c0_31], %72 {strides = array<i32>} : memref<8x128xf32, #tpu.memory_space<vmem>>, vector<8x128xf32>,
    return
  }
  func.func @transform_0(%arg0: i32) -> (i32, i32) {
    %c0_i32 = arith.constant 0 : i32
    %c0_i32_0 = arith.constant 0 : i32
    return %c0_i32, %arg0 : i32, i32
  }
  func.func @transform_1(%arg0: i32) -> (i32, i32) {
    %c0_i32 = arith.constant 0 : i32
    %c0_i32_0 = arith.constant 0 : i32
    %c0_i32_1 = arith.constant 0 : i32
    return %c0_i32, %c0_i32_0 : i32, i32
  }
  func.func @transform_2(%arg0: i32) -> (i32, i32) {
    %c0_i32 = arith.constant 0 : i32
    %c0_i32_0 = arith.constant 0 : i32
    %c0_i32_1 = arith.constant 0 : i32
    return %c0_i32, %c0_i32_0 : i32, i32
  }
  func.func @transform_3(%arg0: i32) -> (i32, i32) {
    %c0_i32 = arith.constant 0 : i32
    %c0_i32_0 = arith.constant 0 : i32
    %c0_i32_1 = arith.constant 0 : i32
    return %c0_i32, %c0_i32_0 : i32, i32
  }
  func.func @transform_4(%arg0: i32) -> (i32, i32) {
    %c0_i32 = arith.constant 0 : i32
    %c0_i32_0 = arith.constant 0 : i32
    %c0_i32_1 = arith.constant 0 : i32
    return %c0_i32, %c0_i32_0 : i32, i32
  }
  func.func @transform_5(%arg0: i32) -> (i32, i32) {
    %c0_i32 = arith.constant 0 : i32
    %c0_i32_0 = arith.constant 0 : i32
    %c0_i32_1 = arith.constant 0 : i32
    return %c0_i32, %c0_i32_0 : i32, i32
  }
  func.func @transform_6(%arg0: i32) -> (i32, i32) {
    %c0_i32 = arith.constant 0 : i32
    %c0_i32_0 = arith.constant 0 : i32
    return %c0_i32, %arg0 : i32, i32
  }
}

</mosaic_0001>

<bundles_post_ra>
// kernel: tpu_custom_call.1
= control target key start
LH: loop header
LB: loop body
LE: loop exit
PB: predicated region body
PF: predicated region fallthrough
CT: control target
= control target key end

     0   :  { %11 = vsyncpa [#allocation3], 0  ;;  %s766_s0 = inlined_call_operand.vmem [shape: f32[4,256], index: 0, kind: input, shape index: {}]   ;;  %s767_s1 = inlined_call_operand.vmem [shape: f32[32,4], index: 1, kind: input, shape index: {}]   ;;  %s768_s2 = inlined_call_operand.vmem [shape: f32[24,8], index: 2, kind: input, shape index: {}]   ;;  %s769_s3 = inlined_call_operand.vmem [shape: f32[8,1], index: 3, kind: input, shape index: {}]   ;;  %s770_s4 = inlined_call_operand.vmem [shape: f32[8,1], index: 4, kind: input, shape index: {}]   ;;  %s771_s5 = inlined_call_operand.vmem [shape: f32[8,1], index: 5, kind: input, shape index: {}]   ;;  %s772_s6 = inlined_call_operand.hbm [shape: f32[8,256], index: 6, kind: output, shape index: {}]  }
   0x1   :  { %13 = vsyncpa [#allocation3 + $0x1], 0  ;;  %s639_s21 = smov 0   ;;  %s641_s22 = smov 0  }
   0x2   :  { %s643_s23 = smov 0   ;;  %s645_s24 = smov 0  }
   0x3 LB: > { %s660_s25 = sadd.s32 4294967295, %s599_s24   ;;  %s472_s26 = sadd.s32 4294967294, %s599_s24   ;;  %s599_s24 = sphi %s645_s24, %s778_s24   ;;  %s595_s23 = sphi %s643_s23, %s777_s23   ;;  %s591_s22 = sphi %s641_s22, %s776_s22   ;;  %s587_s21 = sphi %s639_s21, %s775_s21  }
   0x4   : > { %s664_s27 = sadd.s32 1, %s599_s24   ;;  %s157_s28 = sadd.s32 1, %s595_s23 }
   0x5   : > { %s154_s29 = ssub.s32 %s599_s24, %s664_s27  ;;  %p167_p0 = scmp.ne.s32.totalorder %s595_s23, %s591_s22 }
   0x6   : > { %p155_p1 = scmp.eq.s32.totalorder %s154_s29, 0  ;;  %p168_p2 = scmp.eq.s32.totalorder %s660_s25, 1 }
   0x7   : > { %p173_p3 = scmp.ne.s32.totalorder %s591_s22, %s587_s21  ;;  %p174_p4 = scmp.eq.s32.totalorder %s472_s26, 1 }
   0x8   : > { %s675_s30 = scalar_select %p155_p1, %s595_s23, %s157_s28  }
   0x9   : > { %p677_p5 = por %p168_p2, %p167_p0  ;;  %p681_p6 = por %p174_p4, %p173_p3 }
   0xa   : > { %p475_p7 = scmp.ge.s32.totalorder %s599_s24, 1  ;;  %p214_p8 = scmp.lt.s32.totalorder %s599_s24, 3 }
   0xc   : > { %p215_p9 = pnand %p475_p7, %p214_p8 }
   0xd   : > { %p243_p10 = scmp.lt.s32.totalorder (!%p215_p9), %s660_s25, 1  ;;  %s602_s28 = smov (!%p215_p9), 4  }
   0xe   : > { %218 = sbr.rel (%p215_p9) target bundleno = 541 (0x21d), region = 44  ;;  %s603_s29 = smov (!%p215_p9), 2  }
   0xf   : > { %s240_s26 = sand.u32 (!%p215_p9), 1, %s591_s22   ;;  %s557_s19 = scalar_lea.hbm (!%p215_p9), %s772_s6, 16 }
  0x10   : > { %s398_s15 = scalar_lea.sflag (!%p215_p9), [#allocation3], %s240_s26 }
  0x13   : > { %s244_s9 = scalar_select %p243_p10, %s660_s25, 1  ;;  %vm282_vm0 = vcmask 1043456   ;;  %v248_v0 = vld [vmem:[%s767_s1] sm:$0xff]  ;;  %vm269_vm1 = vcmask 31744   ;;  %v250_v1 = vld [vmem:[%s767_s1 + $0x10] sm:$0xff]  ;;  %v249_v3 = vld [vmem:[%s767_s1 + $0x8] sm:$0xff]  ;;  %v255_v9 = vlaneseq }
  0x14   : > { %v326_v4 = vld [vmem:[%s769_s3] sm:$0xff]  ;;  %v601_v5 = vmov 0   ;;  %v251_v8 = vld [vmem:[%s767_s1 + $0x18] sm:$0xff]  ;;  %vm341_vm4 = vcmask 64512   ;;  %v253_v22 = vld [vmem:[%s768_s2 + $0x8] sm:$0xff] }
  0x15   : > { %s477_s10 = sshll.u32 %s244_s9, 2  ;;  %534 = vset.pattern.permute.xlu1 %v601_v5  ;;  %536 = vset.pattern.permute.xlu0 %v601_v5  ;;  %v256_v11 = vand.u32 127, %v255_v9  ;;  %v252_v21 = vld [vmem:[%s768_s2] sm:$0xff]  ;;  %v254_v23 = vld [vmem:[%s768_s2 + $0x10] sm:$0xff]  ;;  %s487_s9 = sshll.u32 %s660_s25, 3 }
  0x16   : > { %s246_s13 = scalar_lea.vmem %s766_s0, %s477_s10  ;;  %329 = vperm.xlu1 %534, %v326_v4   ;;  %535 = vset.pattern.permute.xlu2 %v601_v5  ;;  %v334_v24 = vld [vmem:[%s771_s5] sm:$0xff]  ;;  %s408_s11 = scalar_lea.hbm %s772_s6, %s487_s9 }
  0x17   : > { %v247_v2 = vld [vmem:[%s246_s13] sm:$0xf]  ;;  %vm317_vm2 = vcmp.lt.s32.totalorder %v256_v11, 4  ;;  %vm322_vm3 = vcmp.lt.s32.totalorder %v256_v11, 2  ;;  %s412_s14 = sshll.u32 %s408_s11, 4  ;;  %s413_s14 = int_to_ptr.hbm [resolvable:$true] %s412_s14 }
  0x18   : > { %478 = vmatpush.msk.msra.mxu0 %vm282_vm0, %v247_v2  ;;  %490 = vmatpush.msk.msra.mxu2 %vm282_vm0, %v247_v2  ;;  %v386_v27 = vld [vmem:[%s770_s4] sm:$0xff]  ;;  %s551_s16 = sshra.s32 %s413_s14, 4  ;;  %s552_s16 = int_to_ptr.hbm [resolvable:$true] %s551_s16 }
  0x19   : > { %479 = vmatmul.msk.f32.vlgmr.msra.gmra.mxu0 %vm269_vm1, %v248_v0  ;;  %481 = vmatmul.msk.f32.vlgmr.msra.gmra.mxu2 %vm269_vm1, %v250_v1  ;;  %s553_s25 = scalar_lea.hbm %s552_s16, 8  ;;  %p558_p0 = scmp.lt.s32.totalorder %s552_s16, %s772_s6 }
  0x1a   : > { %p554_p11 = scmp.ne.s32.totalorder %s552_s16, %s553_s25  ;;  %p559_p1 = scmp.lt.s32.totalorder %s557_s19, %s553_s25 }
  0x1c   : > { %p555_p12 = pnand %p554_p11, %p677_p5  ;;  %p560_p2 = por %p559_p1, %p558_p0 }
  0x1e   : > { %p556_p13 = pneg %p555_p12 }
  0x20   : > { %p561_p3 = pnand %p560_p2, %p556_p13 }
  0x21   : > { %480 = vmatmul.msk.f32.gmra.mxu0 %vm269_vm1, %v249_v3  ;;  %482 = vmatmul.msk.f32.gmra.mxu2 %vm269_vm1, %v251_v8 }
  0x88   : > { %v330_v17 = vpop.permute.xlu1 %329 }
  0x96   : > { %v303_v6 = vpop.f32.mrf.mxu0 }
  0x97   : > { %315 = vrot.lane.b32.xlu0 %v303_v6, %s602_s28 }
  0x9c   : > { %v309_v15 = vpop.f32.mrf.mxu2 }
  0x9e   : > { %v306_v7 = vpop.f32.mrf.mxu0 }
  0x9f   : > { %320 = vrot.lane.b32.xlu0 %v306_v7, %s603_s29 }
  0xa4   : > { %v312_v34 = vpop.f32.mrf.mxu2 }
  0xa7   : > { %337 = vperm.xlu0 %536, %v334_v24  }
 0x109   : > { %v316_v10 = vpop.permute.xlu0 %315 }
 0x10a   : > { %v318_v13 = vsel %vm317_vm2, 0.0, %v316_v10 }
 0x111   : > { %v321_v12 = vpop.permute.xlu0 %320 }
 0x112   : > { %v323_v14 = vsel %vm322_vm3, 0.0, %v321_v12 }
 0x113   : > { %v324_v16 = vadd.f32 %v323_v14, %v318_v13 }
 0x115   : > { %v325_v18 = vadd.f32 %v324_v16, %v309_v15 }
 0x117   : > { %v332_v19 = vadd.f32 %v330_v17, %v325_v18 }
 0x119   : > { %v333_v20 = vmax.f32 %v332_v19, 0.0  ;;  %v338_v36 = vpop.permute.xlu0 %337 }
 0x11a   : > { %v340_v39 = vadd.f32 %v338_v36, %v312_v34 }
 0x11b   : > { %366 = vmatpush.msra.mxu1 %v333_v20  ;;  %491 = vmatpush.msra.mxu3 %v333_v20 }
 0x11c   : > { %483 = vmatmul.msk.f32.vlgmr.msra.gmra.mxu1 %vm341_vm4, %v252_v21  ;;  %484 = vmatmul.msk.f32.vlgmr.msra.gmra.mxu3 %vm341_vm4, %v253_v22 }
 0x124   : > { %485 = vmatmul.msk.f32.gmra.mxu3 %vm341_vm4, %v254_v23 }
 0x199   : > { %v368_v25 = vpop.f32.mrf.mxu1 }
 0x19a   : > { %377 = vrot.lane.b32.xlu1 %v368_v25, %s602_s28  ;;  %s476_s28 = sshll.u32 %s240_s26, 3 }
 0x19b   : > { %s242_s12 = scalar_lea.vmem [#allocation2], %s476_s28 }
 0x19c   : > { %s410_s13 = sshll.u32 %s242_s12, 4  ;;  %s411_s13 = int_to_ptr.vmem [resolvable:$true] %s410_s13 }
 0x19f   : > { %v371_v26 = vpop.f32.mrf.mxu3 }
 0x1a0   : > { %381 = vrot.lane.b32.xlu2 %v371_v26, %s603_s29 }
 0x1a7   : > { %v374_v32 = vpop.f32.mrf.mxu3 }
 0x1a8   : > { %389 = vperm.xlu2 %535, %v386_v27  }
 0x1fa   : > { %v382_v28 = vpop.permute.xlu2 %381 }
 0x1fb   : > { %v383_v30 = vsel %vm322_vm3, 0.0, %v382_v28 }
 0x202   : > { %v390_v35 = vpop.permute.xlu2 %389 }
 0x20c   : > { %v378_v29 = vpop.permute.xlu1 %377 }
 0x20d   : > { %v379_v31 = vsel %vm317_vm2, 0.0, %v378_v29 }
 0x20e   : > { %v384_v33 = vadd.f32 %v383_v30, %v379_v31 }
 0x210   : > { %v385_v37 = vadd.f32 %v384_v33, %v374_v32 }
 0x212   : > { %v392_v38 = vadd.f32 %v390_v35, %v385_v37 }
 0x214   : > { %v393_v40 = vmax.f32 %v392_v38, 0.0 }
 0x216   : > { %v394_v41 = vadd.f32 %v393_v40, %v340_v39 }
 0x218   : > { %v395_v42 = vmax.f32 %v394_v41, 0.0 }
 0x21a   : > { %396 = vst [vmem:[%s242_s12] sm:$0xff] %v395_v42 }
 0x21b   : > { %564 = shalt.err (!%p561_p3)
}
 0x21c   : > { %492 = dma.vmem_to_hbm [thread:$0]  (%p677_p5), %s411_s13, 128, %s413_s14, %s398_s15  }
 0x21d PF: > { %p498_p4 = scmp.ge.s32.totalorder %s599_s24, 2  ;;  %s424_s26 = sand.u32 1, %s587_s21  }
 0x21e   : > { %s425_s9 = scalar_lea.sflag [#allocation3], %s424_s26 }
 0x21f   : > { %p495_p7 = pnand %p498_p4, %p681_p6 }
 0x221   : > { %p496_p8 = pneg %p495_p7 }
 0x223   : > { %582 = dma.done.wait (%p496_p8), %s425_s9, 128  }
 0x224   : > { %584 = vsyncadd (%p496_p8), %s425_s9, 4294967168  ;;  %p16_p9 = scmp.ge.s32.totalorder %s664_s27, 4   ;;  %s775_s21 = smov %s591_s22 }
 0x225   : > { %s776_s22 = smov %s595_s23  ;;  %s777_s23 = smov %s675_s30 }
 0x226   : > { %s778_s24 = smov %s664_s27  ;;  %18 = sbr.rel (!%p16_p9) target bundleno = 3 (0x3), region = 79 }
 0x22b   :  { %431 = vsyncpa [#allocation3], 1 }
 0x22c   :  { %433 = vsyncpa [#allocation3 + $0x1], 1 }

</bundles_post_ra>
